<compile_context>
chip_gen: v5e
topology: v5e:2x2
jax: 0.10.0
libtpu: 0.0.40
codegen_flags: <defaults>
</compile_context>

<pallas_src>
import math

import jax
import jax.numpy as jnp
from jax.experimental import pallas as pl
from jax.experimental.pallas import tpu as pltpu


def _round_up(v: int, m: int) -> int:
    return -(-v // m) * m


def gcn_kernel(x_ref, w_ref, adj_ref, bias_ref, alpha_ref, o_ref, acc_ref):
    """One (row-tile, k-tile) grid step.

    x_ref:    (TK, F_in_p)   bf16   rows of x matching this k-tile of adj columns
    w_ref:    (F_in_p, F_out_p) bf16  resident weight (pre-transposed)
    adj_ref:  (TM, TK)       bf16   adjacency tile
    bias_ref: (1, F_out_p)   f32
    alpha_ref:(1,)           f32    PReLU slope (SMEM)
    o_ref:    (TM, F_out_p)  f32    output tile (written only on the last k step)
    acc_ref:  (TM, F_out_p)  f32    VMEM accumulator scratch
    """
    k = pl.program_id(1)

    @pl.when(k == 0)
    def _init():
        acc_ref[...] = jnp.zeros_like(acc_ref)

    # h_tile = x_tile @ W   (bf16 x bf16 -> f32 accumulate on the MXU)
    h = jnp.dot(x_ref[...], w_ref[...], preferred_element_type=jnp.float32)
    # acc += adj_tile @ h_tile   (bf16 operands, f32 accumulation)
    acc_ref[...] += jnp.dot(
        adj_ref[...], h.astype(adj_ref.dtype), preferred_element_type=jnp.float32
    )

    @pl.when(k == pl.num_programs(1) - 1)
    def _finalize():
        # Epilogue once per row tile, in f32 on the accumulator (VPU-friendly on v5e).
        out = acc_ref[...] + bias_ref[...]
        a = alpha_ref[0]
        o_ref[...] = jnp.where(out > 0.0, out, a * out).astype(o_ref.dtype)


def gcn_forward(x, adj, weight_t, bias, alpha, *, tile_m=512, tile_k=512,
                compute_dtype=jnp.bfloat16):
    """x: (N, F_in), adj: (N, N) dense, weight_t: (F_in, F_out), bias: (F_out,), alpha: scalar."""
    n, f_in = x.shape
    f_out = weight_t.shape[1]

    # Lane-dense padding of feature dims, tile-aligned padding of the node dims.
    f_in_p = _round_up(f_in, 128)
    f_out_p = _round_up(f_out, 128)
    tm = min(tile_m, _round_up(n, 8))      # adj row tile (sublane-aligned)
    tk = min(tile_k, _round_up(n, 128))    # adj reduction tile (lane-aligned)
    n_rows = _round_up(n, tm)
    n_cols = _round_up(n, tk)

    # Zero-pad + cast once in the wrapper (zero padding keeps the math exact).
    x_p = jnp.pad(x.astype(compute_dtype), ((0, n_cols - n), (0, f_in_p - f_in)))
    w_p = jnp.pad(weight_t.astype(compute_dtype), ((0, f_in_p - f_in), (0, f_out_p - f_out)))
    adj_p = jnp.pad(adj.astype(compute_dtype), ((0, n_rows - n), (0, n_cols - n)))
    bias_p = jnp.pad(bias.astype(jnp.float32).reshape(1, f_out), ((0, 0), (0, f_out_p - f_out)))
    alpha_s = jnp.asarray([alpha], dtype=jnp.float32)

    grid = (n_rows // tm, n_cols // tk)

    out_p = pl.pallas_call(
        gcn_kernel,
        out_shape=jax.ShapeDtypeStruct((n_rows, f_out_p), jnp.float32),
        grid_spec=pltpu.PrefetchScalarGridSpec(
            num_scalar_prefetch=0,
            grid=grid,
            in_specs=[
                pl.BlockSpec((tk, f_in_p), lambda i, k: (k, 0)),       # x rows for k-tile
                pl.BlockSpec((f_in_p, f_out_p), lambda i, k: (0, 0)),  # W (resident)
                pl.BlockSpec((tm, tk), lambda i, k: (i, k)),           # adj tile
                pl.BlockSpec((1, f_out_p), lambda i, k: (0, 0)),       # bias (resident)
                pl.BlockSpec(memory_space=pltpu.MemorySpace.SMEM),     # alpha scalar
            ],
            out_specs=pl.BlockSpec((tm, f_out_p), lambda i, k: (i, 0)),
            scratch_shapes=[pltpu.VMEM((tm, f_out_p), jnp.float32)],
        ),
        compiler_params=pltpu.CompilerParams(
            dimension_semantics=("parallel", "arbitrary"),
        ),
    )(x_p, w_p, adj_p, bias_p, alpha_s)

    return out_p[:n, :f_out]


def init_params(key, in_feature, out_feature):
    # nn.init.xavier_uniform_ on fc.weight of shape (out_feature, in_feature)
    bound = math.sqrt(6.0 / (in_feature + out_feature))
    w = jax.random.uniform(
        key, (out_feature, in_feature), minval=-bound, maxval=bound, dtype=jnp.float32
    )
    bias = jnp.zeros((out_feature,), dtype=jnp.float32)  # bias.data.fill_(0.0)
    alpha = jnp.float32(0.25)  # nn.PReLU() default init
    return w, bias, alpha


if __name__ == "__main__":
    # Small but multi-tile: with tile_m=tile_k=128 this exercises a (2, 2) grid,
    # i.e. the accumulator init/finalize path and the padded-feature path (96 -> 128).
    N, F_IN, F_OUT = 256, 64, 96

    key = jax.random.PRNGKey(0)
    kw, kx, ka = jax.random.split(key, 3)

    w, bias, alpha = init_params(kw, F_IN, F_OUT)          # w: (F_OUT, F_IN) torch layout
    x = jax.random.normal(kx, (N, F_IN), dtype=jnp.float32)
    adj = jax.random.uniform(ka, (N, N), dtype=jnp.float32)
    adj = adj / jnp.sum(adj, axis=1, keepdims=True)        # row-normalized dense "adjacency"

    out = gcn_forward(x, adj, w.T, bias, alpha, tile_m=128, tile_k=128)
    out = jax.block_until_ready(out)

    # Reference in plain JAX with the same bf16 operand rounding / f32 accumulation.
    bf = lambda a: a.astype(jnp.bfloat16).astype(jnp.float32)
    h_ref = bf(bf(x) @ bf(w.T))
    o_ref = bf(adj) @ h_ref + bias
    o_ref = jnp.where(o_ref > 0, o_ref, alpha * o_ref)

    assert out.shape == (N, F_OUT)
    assert jnp.allclose(out, o_ref, atol=1e-2, rtol=1e-2), float(jnp.max(jnp.abs(out - o_ref)))
    print("KERNEL_OK")
</pallas_src>

<mosaic_0001>
module attributes {stable_mosaic.version = 11 : i64} {
  func.func @gcn_kernel(%arg0: i32, %arg1: i32, %arg2: memref<128x128xbf16, #tpu.memory_space<vmem>>, %arg3: memref<128x128xbf16, #tpu.memory_space<vmem>>, %arg4: memref<128x128xbf16, #tpu.memory_space<vmem>>, %arg5: memref<1x128xf32, #tpu.memory_space<vmem>>, %arg6: memref<1xf32, #tpu.memory_space<smem>>, %arg7: memref<128x128xf32, #tpu.memory_space<vmem>>, %arg8: memref<128x128xf32, #tpu.memory_space<vmem>>) attributes {dimension_semantics = [#tpu.dimension_semantics<parallel>, #tpu.dimension_semantics<arbitrary>], iteration_bounds = array<i64: 2, 2>, scalar_prefetch = 0 : i64, scratch_operands = 1 : i64, tpu.core_type = #tpu.core_type<tc>, window_params = [{transform_indices = @transform_0, window_bounds = array<i64: 128, 128>}, {pipeline_mode = #tpu.pipeline_mode<synchronous>, transform_indices = @transform_1, window_bounds = array<i64: 128, 128>}, {transform_indices = @transform_2, window_bounds = array<i64: 128, 128>}, {pipeline_mode = #tpu.pipeline_mode<synchronous>, transform_indices = @transform_3, window_bounds = array<i64: 1, 128>}, {transform_indices = @transform_4, window_bounds = array<i64: 1>}, {transform_indices = @transform_5, window_bounds = array<i64: 128, 128>}]} {
    %c0_i32 = arith.constant 0 : i32
    %0 = arith.cmpi eq, %arg1, %c0_i32 : i32
    %1 = arith.extui %0 : i1 to i32
    %c0_i32_0 = arith.constant 0 : i32
    %2 = arith.cmpi ne, %1, %c0_i32_0 : i32
    scf.if %2 {
      %cst_12 = arith.constant 0.000000e+00 : f32
      %15 = vector.broadcast %cst_12 : f32 to vector<128x128xf32>
      %c0_13 = arith.constant 0 : index
      %c0_14 = arith.constant 0 : index
      %16 = vector.load %arg8[%c0_13, %c0_14] : memref<128x128xf32, #tpu.memory_space<vmem>>, vector<128x128xf32>
      tpu.vector_store %arg8[%c0_13, %c0_14], %15 {strides = array<i32>} : memref<128x128xf32, #tpu.memory_space<vmem>>, vector<128x128xf32>,
    } else {
    }
    %c0 = arith.constant 0 : index
    %c0_1 = arith.constant 0 : index
    %3 = vector.load %arg2[%c0, %c0_1] : memref<128x128xbf16, #tpu.memory_space<vmem>>, vector<128x128xbf16>
    %c0_2 = arith.constant 0 : index
    %c0_3 = arith.constant 0 : index
    %4 = vector.load %arg3[%c0_2, %c0_3] : memref<128x128xbf16, #tpu.memory_space<vmem>>, vector<128x128xbf16>
    %cst = arith.constant dense<0.000000e+00> : vector<128x128xf32>
    %5 = tpu.matmul %3, %4, %cst {dimension_numbers = #tpu.dot_dimension_numbers<[1], [0], [0], [1], [0, 0, 1, 1], [], []>} : vector<128x128xbf16>, vector<128x128xbf16>, vector<128x128xf32> -> vector<128x128xf32>
    %c0_4 = arith.constant 0 : index
    %c0_5 = arith.constant 0 : index
    %6 = vector.load %arg8[%c0_4, %c0_5] : memref<128x128xf32, #tpu.memory_space<vmem>>, vector<128x128xf32>
    %c0_6 = arith.constant 0 : index
    %c0_7 = arith.constant 0 : index
    %7 = vector.load %arg4[%c0_6, %c0_7] : memref<128x128xbf16, #tpu.memory_space<vmem>>, vector<128x128xbf16>
    %8 = arith.truncf %5 : vector<128x128xf32> to vector<128x128xbf16>
    %cst_8 = arith.constant dense<0.000000e+00> : vector<128x128xf32>
    %9 = tpu.matmul %7, %8, %cst_8 {dimension_numbers = #tpu.dot_dimension_numbers<[1], [0], [0], [1], [0, 0, 1, 1], [], []>} : vector<128x128xbf16>, vector<128x128xbf16>, vector<128x128xf32> -> vector<128x128xf32>
    %10 = arith.addf %6, %9 : vector<128x128xf32>
    %c0_9 = arith.constant 0 : index
    %c0_10 = arith.constant 0 : index
    %11 = vector.load %arg8[%c0_9, %c0_10] : memref<128x128xf32, #tpu.memory_space<vmem>>, vector<128x128xf32>
    tpu.vector_store %arg8[%c0_9, %c0_10], %10 {strides = array<i32>} : memref<128x128xf32, #tpu.memory_space<vmem>>, vector<128x128xf32>,
    %c1_i32 = arith.constant 1 : i32
    %12 = arith.cmpi eq, %arg1, %c1_i32 : i32
    %13 = arith.extui %12 : i1 to i32
    %c0_i32_11 = arith.constant 0 : i32
    %14 = arith.cmpi ne, %13, %c0_i32_11 : i32
    scf.if %14 {
      %c0_12 = arith.constant 0 : index
      %c0_13 = arith.constant 0 : index
      %15 = vector.load %arg8[%c0_12, %c0_13] : memref<128x128xf32, #tpu.memory_space<vmem>>, vector<128x128xf32>
      %c0_14 = arith.constant 0 : index
      %c0_15 = arith.constant 0 : index
      %16 = vector.load %arg5[%c0_14, %c0_15] : memref<1x128xf32, #tpu.memory_space<vmem>>, vector<1x128xf32>
      %17 = vector.broadcast %16 : vector<1x128xf32> to vector<128x128xf32>
      %18 = arith.addf %15, %17 : vector<128x128xf32>
      %c0_16 = arith.constant 0 : index
      %19 = memref.load %arg6[%c0_16] : memref<1xf32, #tpu.memory_space<smem>>
      %cst_17 = arith.constant 0.000000e+00 : f32
      %20 = vector.broadcast %cst_17 : f32 to vector<128x128xf32>
      %21 = arith.cmpf ogt, %18, %20 : vector<128x128xf32>
      %22 = vector.broadcast %19 : f32 to vector<128x128xf32>
      %23 = arith.mulf %22, %18 : vector<128x128xf32>
      %24 = arith.select %21, %18, %23 : vector<128x128xi1>, vector<128x128xf32>
      %c0_18 = arith.constant 0 : index
      %c0_19 = arith.constant 0 : index
      %25 = vector.load %arg7[%c0_18, %c0_19] : memref<128x128xf32, #tpu.memory_space<vmem>>, vector<128x128xf32>
      tpu.vector_store %arg7[%c0_18, %c0_19], %24 {strides = array<i32>} : memref<128x128xf32, #tpu.memory_space<vmem>>, vector<128x128xf32>,
    } else {
    }
    return
  }
  func.func @transform_0(%arg0: i32, %arg1: i32) -> (i32, i32) {
    %c0_i32 = arith.constant 0 : i32
    %c0_i32_0 = arith.constant 0 : i32
    return %arg1, %c0_i32 : i32, i32
  }
  func.func @transform_1(%arg0: i32, %arg1: i32) -> (i32, i32) {
    %c0_i32 = arith.constant 0 : i32
    %c0_i32_0 = arith.constant 0 : i32
    %c0_i32_1 = arith.constant 0 : i32
    return %c0_i32, %c0_i32_0 : i32, i32
  }
  func.func @transform_2(%arg0: i32, %arg1: i32) -> (i32, i32) {
    %c0_i32 = arith.constant 0 : i32
    return %arg0, %arg1 : i32, i32
  }
  func.func @transform_3(%arg0: i32, %arg1: i32) -> (i32, i32) {
    %c0_i32 = arith.constant 0 : i32
    %c0_i32_0 = arith.constant 0 : i32
    %c0_i32_1 = arith.constant 0 : i32
    return %c0_i32, %c0_i32_0 : i32, i32
  }
  func.func @transform_4(%arg0: i32, %arg1: i32) -> i32 {
    %c0_i32 = arith.constant 0 : i32
    %c0_i32_0 = arith.constant 0 : i32
    return %c0_i32 : i32
  }
  func.func @transform_5(%arg0: i32, %arg1: i32) -> (i32, i32) {
    %c0_i32 = arith.constant 0 : i32
    %c0_i32_0 = arith.constant 0 : i32
    return %arg0, %c0_i32 : i32, i32
  }
}

</mosaic_0001>

<bundles_post_ra>
// kernel: tpu_custom_call.1
= control target key start
LH: loop header
LB: loop body
LE: loop exit
PB: predicated region body
PF: predicated region fallthrough
CT: control target
= control target key end

     0   :  { %s1874_s0 = inlined_call_operand.hbm [shape: bf16[256,128], index: 0, kind: input, shape index: {}]   ;;  %s1875_s1 = inlined_call_operand.hbm [shape: bf16[128,128], index: 1, kind: input, shape index: {}]   ;;  %s1876_s2 = inlined_call_operand.hbm [shape: bf16[256,256], index: 2, kind: input, shape index: {}]   ;;  %s1877_s3 = inlined_call_operand.vmem [shape: f32[1,128], index: 3, kind: input, shape index: {}]   ;;  %s1878_s4 = inlined_call_operand.<no memory space> [shape: f32[1], index: 4, kind: input, shape index: {}]   ;;  %s1879_s5 = inlined_call_operand.hbm [shape: f32[256,128], index: 5, kind: output, shape index: {}]  }
   0x1   :  { %1894 = sst [smem:[#allocation26_spill]] %s1874_s0 }
   0x2   :  { %1895 = sst [smem:[#allocation27_spill]] %s1875_s1 }
   0x3   :  { %1896 = sst [smem:[#allocation28_spill]] %s1877_s3 }
   0x4   :  { %1897 = sst [smem:[#allocation29_spill]] %s1879_s5 }
   0x5   :  { %10 = sst [smem:[#allocation3]] %s1878_s4 }
   0x6   :  { %11 = vsyncpa [#allocation5], 0 }
   0x7   :  { %13 = vsyncpa [#allocation5 + $0x1], 0 }
   0x8   :  { %14 = vsyncpa [#allocation8], 0 }
   0x9   :  { %15 = vsyncpa [#allocation6], 0 }
   0xa   :  { %17 = vsyncpa [#allocation6 + $0x1], 0  ;;  %s1523_s20 = smov 0   ;;  %s1525_s21 = smov 0  }
   0xb   :  { %s1527_s22 = smov 0   ;;  %s1529_s23 = smov 0  }
   0xc   :  { %s1531_s24 = smov 0   ;;  %s1533_s25 = smov 0  }
   0xd   :  { %s1535_s26 = smov 0   ;;  %s1537_s4 = smov 0  }
   0xe   :  { %s1539_s27 = smov 0   ;;  %s1541_s28 = smov 0  }
   0xf   :  { %s1543_s29 = smov 0   ;;  %s1545_s30 = smov 0  }
  0x10   :  { %s1547_s6 = smov 0   ;;  %s1549_s7 = smov 0  }
  0x11 LB: > { %1898 = sst [smem:[#allocation15_spill]] %s1429_s20  ;;  %s32_s8 = sadd.s32 1, %s1473_s30  ;;  %s1481_s7 = sphi %s1549_s7, %s23_s7   ;;  %s1477_s6 = sphi %s1547_s6, %s1946_s6   ;;  %s1473_s30 = sphi %s1545_s30, %s1945_s30   ;;  %s1469_s29 = sphi %s1543_s29, %s1944_s29   ;;  %s1465_s28 = sphi %s1541_s28, %s1943_s28   ;;  %s1461_s27 = sphi %s1539_s27, %s1933_s27   ;;  %s1457_s4 = sphi %s1537_s4, %s1942_s4   ;;  %s1453_s26 = sphi %s1535_s26, %s1941_s26   ;;  %s1449_s25 = sphi %s1533_s25, %s1940_s25   ;;  %s1445_s24 = sphi %s1531_s24, %s1939_s24   ;;  %s1441_s23 = sphi %s1529_s23, %s1938_s23   ;;  %s1437_s22 = sphi %s1527_s22, %s1931_s22   ;;  %s1433_s21 = sphi %s1525_s21, %s1937_s21   ;;  %s1429_s20 = sphi %s1523_s20, %s1936_s20  }
  0x12   : > { %1899 = sst [smem:[#allocation16_spill]] %s1437_s22  ;;  %s35_s9 = sadd.s32 1, %s1477_s6 }
  0x13   : > { %1900 = sst [smem:[#allocation17_spill]] %s1461_s27  ;;  %p33_p0 = scmp.ge.s32.totalorder %s32_s8, 2 }
  0x14   : > { %1901 = sst [smem:[#allocation18_spill]] %s1465_s28  ;;  %s42_s10 = sadd.s32 1, %s1461_s27 }
  0x15   : > { %1902 = sst [smem:[#allocation19_spill]] %s1469_s29  ;;  %p49_p1 = scmp.ne.s32.totalorder %s1461_s27, %s1457_s4 }
  0x16   : > { %p50_p2 = scmp.eq.s32.totalorder %s1481_s7, 0  ;;  %s1948_s8 = smov (%p33_p0, %s32_s8), 0 }
  0x17   : > { %1903 = sst [smem:[#allocation20_spill]] %s1948_s8  ;;  %s1950_s9 = smov (!%p33_p0, %s35_s9), %s1477_s6 }
  0x18   : > { %s39_s11 = ssub.s32 %s1473_s30, %s1948_s8  ;;  %p1606_p3 = por %p50_p2, %p49_p1 }
  0x19   : > { %p37_p4 = scmp.ge.s32.totalorder %s1950_s9, 2  ;;  %p40_p5 = scmp.eq.s32.totalorder %s39_s11, 0 }
  0x1a   : > { %p55_p6 = scmp.ne.s32.totalorder %s1457_s4, %s1453_s26  ;;  %s159_s13 = sadd.s32 1, %s1437_s22 }
  0x1b   : > { %s1952_s9 = smov (%p37_p4, %s1950_s9), 0  ;;  %p1883_p9 = scmp.lt.s32.totalorder %s1481_s7, 4 }
  0x1c   : > { %1905 = sst [smem:[#allocation21_spill]] %s1952_s9  ;;  %s86_s15 = ssub.s32 %s1477_s6, %s1952_s9 }
  0x1d   : > { %s1616_s14 = scalar_select %p40_p5, %s1461_s27, %s42_s10  }
  0x1e   : > { %s88_s16 = sor.u32 %s86_s15, %s39_s11  ;;  %p157_p7 = scmp.eq.s32.totalorder %s86_s15, 0 }
  0x1f   : > { %1906 = sst [smem:[#allocation22_spill]] %s1616_s14  ;;  %p1620_p8 = scmp.eq.s32.totalorder %s88_s16, 0 }
  0x20   : > { %s1625_s18 = scalar_select %p157_p7, %s1437_s22, %s159_s13  }
  0x21   : > { %s216_s19 = sand.u32 1, %s1481_s7   ;;  %s218_s8 = sand.u32 1, %s1461_s27  }
  0x22   : > { %1908 = sst [smem:[#allocation23_spill]] %s1625_s18  ;;  %s930_s5 = sshll.u32 %s218_s8, 6 }
  0x23   : > { %s1045_s10 = sshll.u32 %s1473_s30, 6  ;;  %s1909_s0 = sld [smem:[#allocation26_spill]] }
  0x24   : > { %s220_s15 = scalar_lea.vmem [#allocation4], %s930_s5  ;;  %p1103_p10 = pnand %p1883_p9, %p1606_p3 }
  0x25   : > { %s228_s13 = sshll.u32 %s220_s15, 4  ;;  %s1638_s8 = scalar_lea.sflag [#allocation5], %s216_s19  ;;  %s229_s13 = int_to_ptr.vmem [resolvable:$true] %s228_s13 }
  0x26   : > { %s1884_s9 = smov 64   ;;  %s1886_s14 = smov 4  }
  0x27   : > { %s1645_s5 = sadd.s32 4294967295, %s1481_s7   ;;  %s926_s12 = sadd.s32 4294967294, %s1481_s7  }
  0x28   : > { %p56_p11 = scmp.eq.s32.totalorder %s1645_s5, 0  ;;  %p104_p12 = scmp.ne.s32.totalorder %s1445_s24, %s1441_s23 }
  0x29   : > { %s225_s11 = scalar_lea.hbm %s1909_s0, %s1045_s10  ;;  %p169_p13 = scmp.ne.s32.totalorder %s1437_s22, %s1433_s21 }
  0x2a   : > { %s226_s16 = sshll.u32 %s225_s11, 4  ;;  %p1658_p0 = por %p56_p11, %p55_p6  ;;  %s227_s16 = int_to_ptr.hbm [resolvable:$true] %s226_s16 }
  0x2b   : > { %1105 = dma.hbm_to_vmem [thread:$0]  (!%p1103_p10), %s227_s16, 1024, %s229_s13, %s1638_s8, %s1884_s9, %s1884_s9, %s1886_s14  }
  0x2c   : > { %p170_p1 = scmp.eq.s32.totalorder %s1645_s5, 3  ;;  %p1665_p3 = por %p104_p12, %p56_p11 }
  0x2d   : > { %p175_p4 = scmp.ne.s32.totalorder %s1433_s21, %s1429_s20  ;;  %p176_p6 = scmp.eq.s32.totalorder %s926_s12, 3 }
  0x2e   : > { %p1671_p5 = por %p170_p1, %p169_p13  ;;  %p927_p7 = scmp.ge.s32.totalorder %s1481_s7, 1 }
  0x2f   : > { %p183_p10 = scmp.lt.s32.totalorder %s1481_s7, 5  ;;  %p1677_p9 = por %p176_p6, %p175_p4 }
  0x30   : > { %s1912_s23 = scalar_select %p1671_p5, 1, 0 }
  0x31   : > { %s1914_s26 = scalar_select %p1677_p9, 1, 0 }
  0x32   : > { %1913 = sst [smem:[#allocation24_spill]] %s1912_s23  ;;  %p1681_p12 = pnand %p927_p7, %p183_p10 }
  0x33   : > { %1915 = sst [smem:[#allocation25_spill]] %s1914_s26  ;;  %s1485_s12 = smov [#allocation7]  }
  0x34   : > { %s1917_s1 = sld [smem:[#allocation27_spill]]  ;;  %p1098_p13 = pneg %p1681_p12 }
  0x35   : > { %s196_s9 = sshll.u32 %s1485_s12, 4  ;;  %s91_s14 = sadd.s32 1, %s1449_s25  ;;  %s197_s9 = int_to_ptr.vmem [resolvable:$true] %s196_s9 }
  0x36   : > { %p1099_p1 = pnand %p1098_p13, %p56_p11  ;;  %p98_p4 = scmp.ne.s32.totalorder %s1449_s25, %s1445_s24 }
  0x37   : > { %s240_s0 = sand.u32 1, %s1449_s25   ;;  %s1918_s27 = smov 4  }
  0x38   : > { %s1919_s18 = smov 64   ;;  %p100_p6 = por %p98_p4, %p50_p2 }
  0x39   : > { %s1702_s15 = scalar_select %p1620_p8, %s1449_s25, %s91_s14  }
  0x3a   : > { %s194_s16 = sshll.u32 %s1917_s1, 4  ;;  %s933_s13 = sshll.u32 %s240_s0, 6  ;;  %s195_s16 = int_to_ptr.hbm [resolvable:$true] %s194_s16 }
  0x3b   : > { %1101 = dma.hbm_to_vmem [thread:$0]  (!%p1099_p1), %s195_s16, 1024, %s197_s9, [#allocation8], %s1919_s18, %s1919_s18, %s1918_s27  }
  0x3c   : > { %s1046_s1 = sshll.u32 %s1477_s6, 5  ;;  %s242_s22 = scalar_lea.vmem [#allocation9], %s933_s13 }
  0x3d   : > { %s247_s12 = sadd.s32 %s1473_s30, %s1046_s1  ;;  %s252_s26 = sshll.u32 %s242_s22, 4  ;;  %s253_s26 = int_to_ptr.vmem [resolvable:$true] %s252_s26 }
  0x3e   : > { %s936_s20 = sshll.u32 %s247_s12, 2  ;;  %p1920_p7 = scmp.lt.s32.totalorder %s1481_s7, 4 }
  0x3f   : > { %s249_s3 = scalar_lea.hbm %s1876_s2, %s936_s20  ;;  %s1486_s17 = smov 128  }
  0x40   : > { %p1106_p10 = pnand %p1920_p7, %p100_p6  ;;  %s250_s28 = sshll.u32 %s249_s3, 4  ;;  %s251_s28 = int_to_ptr.hbm [resolvable:$true] %s250_s28 }
  0x41   : > { %264 = sbr.rel (%p1681_p12) target bundleno = 597 (0x255), region = 40  ;;  %s266_s0 = sand.u32 (!%p1681_p12), 1, %s1645_s5  }
  0x42   : > { %1108 = dma.hbm_to_vmem [thread:$0]  (!%p1106_p10), %s251_s28, 1024, %s253_s26, %s1638_s8, %s1486_s17, %s1919_s18, %s1918_s27  }
  0x43   : > { %s268_s1 = sand.u32 (!%p1681_p12), 1, %s1457_s4   ;;  %s267_s9 = scalar_lea.sflag (!%p1681_p12), [#allocation5], %s266_s0 }
  0x44   : > { %s938_s22 = sshll.u32 (!%p1681_p12), %s268_s1, 6 }
  0x45   : > { %s1720_s29 = scalar_lea.vmem (!%p1681_p12), [#allocation4], %s938_s22 }
  0x46   : > { %1412 = dma.done.wait (%p1658_p0), %s267_s9, 1024  }
  0x47   : > { %1414 = vsyncadd (%p1658_p0), %s267_s9, 4294966272 }
  0x48   : > { %1416 = dma.done.wait (%p56_p11), [#allocation8], 1024  }
  0x49   : > { %1418 = vsyncadd (%p56_p11), [#allocation8], 4294966272  ;;  %s283_s3 = sand.u32 1, %s1445_s24  }
  0x4a   : > { %s940_s20 = sshll.u32 %s283_s3, 6 }
  0x4b   : > { %s1731_s27 = scalar_lea.vmem [#allocation9], %s940_s20 }
  0x4c   : > { %1420 = dma.done.wait (%p1665_p3), %s267_s9, 1024  }
  0x4d   : > { %1422 = vsyncadd (%p1665_p3), %s267_s9, 4294966272  ;;  %s315_s28 = sand.u32 1, %s1433_s21   ;;  %s1921_s14 = sld [smem:[#allocation18_spill]] }
  0x4e   : > { %s941_s18 = sshll.u32 %s315_s28, 7 }
  0x4f   : > { %s1740_s8 = scalar_lea.vmem [#allocation10], %s941_s18 }
  0x53   : > { %p942_p2 = scmp.ne.s32.totalorder %s1921_s14, 0 }
  0x55   : > { %324 = sbr.rel (%p942_p2) target bundleno = 107 (0x6b), region = 56 }
  0x5a   : > { %v1487_v0 = vmov 0.0  }
  0x5b   : > { %325 = vst [vmem:[#allocation2 + $0x30] sm:$0xff] %v1487_v0 }
  0x5c   : > { %326 = vst [vmem:[#allocation2] sm:$0xff] %v1487_v0 }
  0x5d   : > { %327 = vst [vmem:[#allocation2 + $0x58] sm:$0xff] %v1487_v0 }
  0x5e   : > { %328 = vst [vmem:[#allocation2 + $0x18] sm:$0xff] %v1487_v0 }
  0x5f   : > { %329 = vst [vmem:[#allocation2 + $0x50] sm:$0xff] %v1487_v0 }
  0x60   : > { %330 = vst [vmem:[#allocation2 + $0x68] sm:$0xff] %v1487_v0 }
  0x61   : > { %331 = vst [vmem:[#allocation2 + $0x8] sm:$0xff] %v1487_v0 }
  0x62   : > { %332 = vst [vmem:[#allocation2 + $0x48] sm:$0xff] %v1487_v0 }
  0x63   : > { %333 = vst [vmem:[#allocation2 + $0x40] sm:$0xff] %v1487_v0 }
  0x64   : > { %334 = vst [vmem:[#allocation2 + $0x20] sm:$0xff] %v1487_v0 }
  0x65   : > { %335 = vst [vmem:[#allocation2 + $0x10] sm:$0xff] %v1487_v0 }
  0x66   : > { %336 = vst [vmem:[#allocation2 + $0x38] sm:$0xff] %v1487_v0 }
  0x67   : > { %337 = vst [vmem:[#allocation2 + $0x60] sm:$0xff] %v1487_v0 }
  0x68   : > { %338 = vst [vmem:[#allocation2 + $0x70] sm:$0xff] %v1487_v0 }
  0x69   : > { %339 = vst [vmem:[#allocation2 + $0x78] sm:$0xff] %v1487_v0 }
  0x6a   : > { %340 = vst [vmem:[#allocation2 + $0x28] sm:$0xff] %v1487_v0 }
  0x6b PF: > { %v1062_v1 = vld [vmem:[#allocation7 + $0x38] sm:$0xff]  ;;  %v1061_v2 = vld [vmem:[#allocation7 + $0x30] sm:$0xff]  ;;  %v1060_v3 = vld [vmem:[#allocation7 + $0x28] sm:$0xff]  ;;  %s1922_s5 = sld [smem:[#allocation18_spill]] }
  0x6c   : > { %1072 = vmatpush.bf16.msra.mxu2 %v1062_v1  ;;  %469 = vmatpush.bf16.msra.mxu0 %v1062_v1  ;;  %v1059_v4 = vld [vmem:[#allocation7 + $0x20] sm:$0xff]  ;;  %v1058_v5 = vld [vmem:[#allocation7 + $0x18] sm:$0xff]  ;;  %v1057_v6 = vld [vmem:[#allocation7 + $0x10] sm:$0xff] }
  0x6d   : > { %v1056_v7 = vld [vmem:[#allocation7 + $0x8] sm:$0xff]  ;;  %v1055_v8 = vld [vmem:[#allocation7] sm:$0xff]  ;;  %v1053_v13 = vld [vmem:[%s1720_s29 + $0x30] sm:$0xff] }
  0x6e   : > { %v1051_v9 = vld [vmem:[%s1720_s29 + $0x20] sm:$0xff]  ;;  %v1052_v11 = vld [vmem:[%s1720_s29 + $0x28] sm:$0xff]  ;;  %v1049_v14 = vld [vmem:[%s1720_s29 + $0x10] sm:$0xff] }
  0x6f   : > { %v1047_v10 = vld [vmem:[%s1720_s29] sm:$0xff]  ;;  %v1048_v12 = vld [vmem:[%s1720_s29 + $0x8] sm:$0xff]  ;;  %v1054_v15 = vld [vmem:[%s1720_s29 + $0x38] sm:$0xff] }
  0x70   : > { %1073 = vmatpush.bf16.msra.mxu2 %v1061_v2  ;;  %470 = vmatpush.bf16.msra.mxu0 %v1061_v2  ;;  %v1050_v16 = vld [vmem:[%s1720_s29 + $0x18] sm:$0xff]  ;;  %v1063_v41 = vld [vmem:[%s1731_s27] sm:$0xff]  ;;  %v1064_v43 = vld [vmem:[%s1731_s27 + $0x8] sm:$0xff] }
  0x71   : > { %v1067_v42 = vld [vmem:[%s1731_s27 + $0x20] sm:$0xff]  ;;  %v1068_v44 = vld [vmem:[%s1731_s27 + $0x28] sm:$0xff]  ;;  %v1065_v45 = vld [vmem:[%s1731_s27 + $0x10] sm:$0xff]  ;;  %p1039_p8 = scmp.ne.s32.totalorder %s1922_s5, 1 }
  0x72   : > { %v1069_v46 = vld [vmem:[%s1731_s27 + $0x30] sm:$0xff]  ;;  %v1066_v47 = vld [vmem:[%s1731_s27 + $0x18] sm:$0xff]  ;;  %v526_v52 = vld [vmem:[#allocation2 + $0x40] sm:$0xff]  ;;  %s1923_s23 = sld [smem:[#allocation28_spill]] (!%p1039_p8) }
  0x73   : > { %v1070_v48 = vld [vmem:[%s1731_s27 + $0x38] sm:$0xff]  ;;  %v518_v49 = vld [vmem:[#allocation2 + $0x30] sm:$0xff]  ;;  %v519_v54 = vld [vmem:[#allocation2] sm:$0xff]  ;;  %s727_s26 = sld [smem:[#allocation3]] (!%p1039_p8) }
  0x74   : > { %1074 = vmatpush.bf16.msra.mxu2 %v1060_v3  ;;  %471 = vmatpush.bf16.msra.mxu0 %v1060_v3  ;;  %v527_v58 = vld [vmem:[#allocation2 + $0x20] sm:$0xff]  ;;  %v520_v60 = vld [vmem:[#allocation2 + $0x58] sm:$0xff]  ;;  %v528_v0 = vld [vmem:[#allocation2 + $0x10] sm:$0xff] }
  0x75   : > { %v521_v2 = vld [vmem:[#allocation2 + $0x18] sm:$0xff] }
  0x78   : > { %1075 = vmatpush.bf16.msra.mxu2 %v1059_v4  ;;  %472 = vmatpush.bf16.msra.mxu0 %v1059_v4 }
  0x7c   : > { %1076 = vmatpush.bf16.msra.mxu2 %v1058_v5  ;;  %473 = vmatpush.bf16.msra.mxu0 %v1058_v5 }
  0x80   : > { %1077 = vmatpush.bf16.msra.mxu2 %v1057_v6  ;;  %474 = vmatpush.bf16.msra.mxu0 %v1057_v6  ;;  %v529_v6 = vld [vmem:[#allocation2 + $0x38] sm:$0xff] }
  0x84   : > { %1078 = vmatpush.bf16.msra.mxu2 %v1056_v7  ;;  %475 = vmatpush.bf16.msra.mxu0 %v1056_v7 }
  0x88   : > { %1079 = vmatpush.bf16.msra.mxu2 %v1055_v8  ;;  %476 = vmatpush.bf16.msra.mxu0 %v1055_v8  ;;  %v522_v8 = vld [vmem:[#allocation2 + $0x50] sm:$0xff] }
  0x8b   : > { %497 = vmatmul.bf16.vlgmr.msra.gmra.mxu2 %v1051_v9  ;;  %477 = vmatmul.bf16.vlgmr.msra.gmra.mxu0 %v1047_v10 }
  0x9b   : > { %502 = vmatmul.bf16.gmra.mxu2 %v1052_v11  ;;  %482 = vmatmul.bf16.gmra.mxu0 %v1048_v12  ;;  %v530_v12 = vld [vmem:[#allocation2 + $0x60] sm:$0xff] }
  0xab   : > { %507 = vmatmul.bf16.gmra.mxu2 %v1053_v13  ;;  %487 = vmatmul.bf16.gmra.mxu0 %v1049_v14  ;;  %v523_v14 = vld [vmem:[#allocation2 + $0x68] sm:$0xff] }
  0xbb   : > { %512 = vmatmul.bf16.gmra.mxu2 %v1054_v15  ;;  %492 = vmatmul.bf16.gmra.mxu0 %v1050_v16 }
 0x108   : > { %v478_v18 = vpop.f32.mrf.mxu0 }
 0x10e   : > { %v498_v17 = vpop.f32.mrf.mxu2 }
 0x110   : > { %v480_v20 = vpop.f32.mrf.mxu0 }
 0x111   : > { %v550_v40 = vpack.c.bf16 %v480_v20, %v478_v18  ;;  %v531_v18 = vld [vmem:[#allocation2 + $0x70] sm:$0xff]  ;;  %v524_v20 = vld [vmem:[#allocation2 + $0x8] sm:$0xff] }
 0x116   : > { %v500_v19 = vpop.f32.mrf.mxu2 }
 0x117   : > { %v554_v35 = vpack.c.bf16 %v500_v19, %v498_v17 }
 0x118   : > { %v483_v22 = vpop.f32.mrf.mxu0 }
 0x11e   : > { %v503_v21 = vpop.f32.mrf.mxu2 }
 0x120   : > { %v485_v24 = vpop.f32.mrf.mxu0 }
 0x121   : > { %v551_v39 = vpack.c.bf16 %v485_v24, %v483_v22  ;;  %v532_v24 = vld [vmem:[#allocation2 + $0x78] sm:$0xff] }
 0x126   : > { %v505_v23 = vpop.f32.mrf.mxu2 }
 0x127   : > { %v555_v34 = vpack.c.bf16 %v505_v23, %v503_v21 }
 0x128   : > { %v488_v26 = vpop.f32.mrf.mxu0 }
 0x12e   : > { %v508_v25 = vpop.f32.mrf.mxu2 }
 0x130   : > { %v490_v29 = vpop.f32.mrf.mxu0 }
 0x131   : > { %v552_v38 = vpack.c.bf16 %v490_v29, %v488_v26  ;;  %v525_v26 = vld [vmem:[#allocation2 + $0x48] sm:$0xff] }
 0x136   : > { %v510_v27 = vpop.f32.mrf.mxu2 }
 0x137   : > { %v556_v33 = vpack.c.bf16 %v510_v27, %v508_v25 }
 0x138   : > { %v493_v32 = vpop.f32.mrf.mxu0 }
 0x13e   : > { %v513_v28 = vpop.f32.mrf.mxu2 }
 0x140   : > { %v495_v36 = vpop.f32.mrf.mxu0 }
 0x141   : > { %v553_v37 = vpack.c.bf16 %v495_v36, %v493_v32 }
 0x146   : > { %v515_v30 = vpop.f32.mrf.mxu2 }
 0x147   : > { %v557_v31 = vpack.c.bf16 %v515_v30, %v513_v28  ;;  %v533_v30 = vld [vmem:[#allocation2 + $0x28] sm:$0xff] }
 0x149   : > { %606 = vmatpush.bf16.msra.mxu1 %v557_v31  ;;  %1080 = vmatpush.bf16.msra.mxu3 %v557_v31 }
 0x14d   : > { %607 = vmatpush.bf16.msra.mxu1 %v556_v33  ;;  %1081 = vmatpush.bf16.msra.mxu3 %v556_v33 }
 0x151   : > { %608 = vmatpush.bf16.msra.mxu1 %v555_v34  ;;  %1082 = vmatpush.bf16.msra.mxu3 %v555_v34 }
 0x155   : > { %609 = vmatpush.bf16.msra.mxu1 %v554_v35  ;;  %1083 = vmatpush.bf16.msra.mxu3 %v554_v35 }
 0x159   : > { %610 = vmatpush.bf16.msra.mxu1 %v553_v37  ;;  %1084 = vmatpush.bf16.msra.mxu3 %v553_v37 }
 0x15d   : > { %611 = vmatpush.bf16.msra.mxu1 %v552_v38  ;;  %1085 = vmatpush.bf16.msra.mxu3 %v552_v38 }
 0x161   : > { %612 = vmatpush.bf16.msra.mxu1 %v551_v39  ;;  %1086 = vmatpush.bf16.msra.mxu3 %v551_v39 }
 0x165   : > { %613 = vmatpush.bf16.msra.mxu1 %v550_v40  ;;  %1087 = vmatpush.bf16.msra.mxu3 %v550_v40 }
 0x168   : > { %614 = vmatmul.bf16.vlgmr.msra.gmra.mxu1 %v1063_v41  ;;  %634 = vmatmul.bf16.vlgmr.msra.gmra.mxu3 %v1067_v42 }
 0x178   : > { %619 = vmatmul.bf16.gmra.mxu1 %v1064_v43  ;;  %639 = vmatmul.bf16.gmra.mxu3 %v1068_v44 }
 0x188   : > { %624 = vmatmul.bf16.gmra.mxu1 %v1065_v45  ;;  %644 = vmatmul.bf16.gmra.mxu3 %v1069_v46 }
 0x198   : > { %629 = vmatmul.bf16.gmra.mxu1 %v1066_v47  ;;  %649 = vmatmul.bf16.gmra.mxu3 %v1070_v48 }
 0x1e5   : > { %v615_v50 = vpop.f32.mrf.mxu1 }
 0x1e6   : > { %v655_v51 = vadd.f32 %v615_v50, %v518_v49 }
 0x1e8   : > { %671 = vst [vmem:[#allocation2 + $0x30] sm:$0xff] %v655_v51 }
 0x1eb   : > { %v635_v53 = vpop.f32.mrf.mxu3 }
 0x1ec   : > { %v663_v55 = vadd.f32 %v635_v53, %v526_v52 }
 0x1ed   : > { %v617_v56 = vpop.f32.mrf.mxu1 }
 0x1ee   : > { %679 = vst [vmem:[#allocation2 + $0x40] sm:$0xff] %v663_v55  ;;  %v656_v57 = vadd.f32 %v617_v56, %v519_v54 }
 0x1f0   : > { %672 = vst [vmem:[#allocation2] sm:$0xff] %v656_v57 }
 0x1f3   : > { %v637_v59 = vpop.f32.mrf.mxu3 }
 0x1f4   : > { %v664_v61 = vadd.f32 %v637_v59, %v527_v58 }
 0x1f5   : > { %v620_v62 = vpop.f32.mrf.mxu1 }
 0x1f6   : > { %680 = vst [vmem:[#allocation2 + $0x20] sm:$0xff] %v664_v61  ;;  %v657_v63 = vadd.f32 %v620_v62, %v520_v60 }
 0x1f8   : > { %673 = vst [vmem:[#allocation2 + $0x58] sm:$0xff] %v657_v63 }
 0x1fb   : > { %v640_v1 = vpop.f32.mrf.mxu3 }
 0x1fc   : > { %v665_v3 = vadd.f32 %v640_v1, %v528_v0 }
 0x1fd   : > { %v622_v4 = vpop.f32.mrf.mxu1 }
 0x1fe   : > { %681 = vst [vmem:[#allocation2 + $0x10] sm:$0xff] %v665_v3  ;;  %v658_v5 = vadd.f32 %v622_v4, %v521_v2 }
 0x200   : > { %674 = vst [vmem:[#allocation2 + $0x18] sm:$0xff] %v658_v5 }
 0x203   : > { %v642_v7 = vpop.f32.mrf.mxu3 }
 0x204   : > { %v666_v9 = vadd.f32 %v642_v7, %v529_v6 }
 0x205   : > { %v625_v10 = vpop.f32.mrf.mxu1 }
 0x206   : > { %682 = vst [vmem:[#allocation2 + $0x38] sm:$0xff] %v666_v9  ;;  %v659_v11 = vadd.f32 %v625_v10, %v522_v8 }
 0x208   : > { %675 = vst [vmem:[#allocation2 + $0x50] sm:$0xff] %v659_v11 }
 0x20b   : > { %v645_v13 = vpop.f32.mrf.mxu3 }
 0x20c   : > { %v667_v15 = vadd.f32 %v645_v13, %v530_v12 }
 0x20d   : > { %v627_v16 = vpop.f32.mrf.mxu1 }
 0x20e   : > { %683 = vst [vmem:[#allocation2 + $0x60] sm:$0xff] %v667_v15  ;;  %v660_v17 = vadd.f32 %v627_v16, %v523_v14 }
 0x210   : > { %676 = vst [vmem:[#allocation2 + $0x68] sm:$0xff] %v660_v17 }
 0x213   : > { %v647_v19 = vpop.f32.mrf.mxu3 }
 0x214   : > { %v668_v21 = vadd.f32 %v647_v19, %v531_v18 }
 0x215   : > { %v630_v22 = vpop.f32.mrf.mxu1 }
 0x216   : > { %684 = vst [vmem:[#allocation2 + $0x70] sm:$0xff] %v668_v21  ;;  %v661_v23 = vadd.f32 %v630_v22, %v524_v20 }
 0x218   : > { %677 = vst [vmem:[#allocation2 + $0x8] sm:$0xff] %v661_v23 }
 0x21b   : > { %v650_v25 = vpop.f32.mrf.mxu3 }
 0x21c   : > { %v669_v27 = vadd.f32 %v650_v25, %v532_v24 }
 0x21d   : > { %v632_v28 = vpop.f32.mrf.mxu1 }
 0x21e   : > { %685 = vst [vmem:[#allocation2 + $0x78] sm:$0xff] %v669_v27  ;;  %v662_v29 = vadd.f32 %v632_v28, %v525_v26 }
 0x220   : > { %678 = vst [vmem:[#allocation2 + $0x48] sm:$0xff] %v662_v29 }
 0x222   : > { %690 = sbr.rel (%p1039_p8) target bundleno = 575 (0x23f), region = 60 }
 0x223   : > { %v652_v31 = vpop.f32.mrf.mxu3 }
 0x224   : > { %v670_v32 = vadd.f32 %v652_v31, %v533_v30 }
 0x226   : > { %686 = vst [vmem:[#allocation2 + $0x28] sm:$0xff] %v670_v32 }
 0x227   : > { %v691_v33 = vld [vmem:[#allocation2 + $0x30] sm:$0xff]  ;;  %v1763_v34 = vld [vmem:[%s1923_s23] ss:$0 sm:$0xff]  ;;  %v693_v36 = vld [vmem:[#allocation2 + $0x58] sm:$0xff]  ;;  %v744_v52 = vstv %s727_s26 }
 0x228   : > { %v692_v35 = vld [vmem:[#allocation2] sm:$0xff]  ;;  %v694_v37 = vld [vmem:[#allocation2 + $0x18] sm:$0xff]  ;;  %v711_v38 = vadd.f32 %v1763_v34, %v691_v33  ;;  %v713_v40 = vadd.f32 %v1763_v34, %v693_v36  ;;  %v695_v42 = vld [vmem:[#allocation2 + $0x50] sm:$0xff] }
 0x229   : > { %v712_v39 = vadd.f32 %v1763_v34, %v692_v35  ;;  %v714_v41 = vadd.f32 %v1763_v34, %v694_v37  ;;  %v696_v43 = vld [vmem:[#allocation2 + $0x68] sm:$0xff]  ;;  %v715_v45 = vadd.f32 %v1763_v34, %v695_v42  ;;  %v699_v48 = vld [vmem:[#allocation2 + $0x40] sm:$0xff]  ;;  %v701_v51 = vld [vmem:[#allocation2 + $0x10] sm:$0xff] }
 0x22a   : > { %v697_v44 = vld [vmem:[#allocation2 + $0x8] sm:$0xff]  ;;  %v716_v46 = vadd.f32 %v1763_v34, %v696_v43  ;;  %vm728_vm0 = vcmp.gt.f32.partialorder %v711_v38, 0.0  ;;  %vm730_vm2 = vcmp.gt.f32.partialorder %v713_v40, 0.0  ;;  %v700_v50 = vld [vmem:[#allocation2 + $0x20] sm:$0xff]  ;;  %v719_v54 = vadd.f32 %v1763_v34, %v699_v48  ;;  %v702_v59 = vld [vmem:[#allocation2 + $0x38] sm:$0xff] }
 0x22b   : > { %v698_v47 = vld [vmem:[#allocation2 + $0x48] sm:$0xff]  ;;  %v717_v49 = vadd.f32 %v1763_v34, %v697_v44  ;;  %vm729_vm1 = vcmp.gt.f32.partialorder %v712_v39, 0.0  ;;  %vm731_vm3 = vcmp.gt.f32.partialorder %v714_v41, 0.0  ;;  %vm732_vm4 = vcmp.gt.f32.partialorder %v715_v45, 0.0  ;;  %v703_v0 = vld [vmem:[#allocation2 + $0x60] sm:$0xff]  ;;  %v704_v5 = vld [vmem:[#allocation2 + $0x70] sm:$0xff] }
 0x22c   : > { %vm733_vm5 = vcmp.gt.f32.partialorder %v716_v46, 0.0  ;;  %v718_v53 = vadd.f32 %v1763_v34, %v698_v47  ;;  %v745_v55 = vmul.f32 %v744_v52, %v711_v38  ;;  %v746_v56 = vmul.f32 %v744_v52, %v712_v39  ;;  %v705_v15 = vld [vmem:[#allocation2 + $0x78] sm:$0xff] }
 0x22d   : > { %v747_v57 = vmul.f32 %v744_v52, %v713_v40  ;;  %v748_v58 = vmul.f32 %v744_v52, %v714_v41  ;;  %v749_v60 = vmul.f32 %v744_v52, %v715_v45  ;;  %v750_v61 = vmul.f32 %v744_v52, %v716_v46  ;;  %v706_v16 = vld [vmem:[#allocation2 + $0x28] sm:$0xff] }
 0x22e   : > { %v720_v62 = vadd.f32 %v1763_v34, %v700_v50  ;;  %v721_v63 = vadd.f32 %v1763_v34, %v701_v51  ;;  %v761_v1 = vsel %vm728_vm0, %v711_v38, %v745_v55  ;;  %v762_v2 = vsel %vm729_vm1, %v712_v39, %v746_v56 }
 0x22f   : > { %v763_v3 = vsel %vm730_vm2, %v713_v40, %v747_v57  ;;  %v751_v4 = vmul.f32 %v744_v52, %v717_v49  ;;  %777 = vst [vmem:[%s1740_s8] sm:$0xff] %v761_v1  ;;  %v764_v6 = vsel %vm731_vm3, %v714_v41, %v748_v58  ;;  %vm734_vm6 = vcmp.gt.f32.partialorder %v717_v49, 0.0 }
 0x230   : > { %v752_v7 = vmul.f32 %v744_v52, %v718_v53  ;;  %v722_v8 = vadd.f32 %v1763_v34, %v702_v59  ;;  %778 = vst [vmem:[%s1740_s8 + $0x8] sm:$0xff] %v762_v2  ;;  %v765_v9 = vsel %vm732_vm4, %v715_v45, %v749_v60  ;;  %vm735_vm7 = vcmp.gt.f32.partialorder %v718_v53, 0.0 }
 0x231   : > { %v753_v10 = vmul.f32 %v744_v52, %v719_v54  ;;  %v723_v11 = vadd.f32 %v1763_v34, %v703_v0  ;;  %779 = vst [vmem:[%s1740_s8 + $0x10] sm:$0xff] %v763_v3  ;;  %v766_v12 = vsel %vm733_vm5, %v716_v46, %v750_v61  ;;  %vm736_vm8 = vcmp.gt.f32.partialorder %v719_v54, 0.0 }
 0x232   : > { %v754_v13 = vmul.f32 %v744_v52, %v720_v62  ;;  %v724_v14 = vadd.f32 %v1763_v34, %v704_v5  ;;  %780 = vst [vmem:[%s1740_s8 + $0x18] sm:$0xff] %v764_v6  ;;  %v767_v17 = vsel %vm734_vm6, %v717_v49, %v751_v4  ;;  %vm737_vm9 = vcmp.gt.f32.partialorder %v720_v62, 0.0 }
 0x233   : > { %v755_v18 = vmul.f32 %v744_v52, %v721_v63  ;;  %781 = vst [vmem:[%s1740_s8 + $0x20] sm:$0xff] %v765_v9  ;;  %v768_v19 = vsel %vm735_vm7, %v718_v53, %v752_v7  ;;  %vm738_vm10 = vcmp.gt.f32.partialorder %v721_v63, 0.0  ;;  %vm739_vm11 = vcmp.gt.f32.partialorder %v722_v8, 0.0 }
 0x234   : > { %v756_v20 = vmul.f32 %v744_v52, %v722_v8  ;;  %782 = vst [vmem:[%s1740_s8 + $0x28] sm:$0xff] %v766_v12  ;;  %v769_v21 = vsel %vm736_vm8, %v719_v54, %v753_v10  ;;  %v757_v22 = vmul.f32 %v744_v52, %v723_v11  ;;  %v725_v23 = vadd.f32 %v1763_v34, %v705_v15 }
 0x235   : > { %v726_v24 = vadd.f32 %v1763_v34, %v706_v16  ;;  %783 = vst [vmem:[%s1740_s8 + $0x30] sm:$0xff] %v767_v17  ;;  %v770_v25 = vsel %vm737_vm9, %v720_v62, %v754_v13  ;;  %vm740_vm12 = vcmp.gt.f32.partialorder %v723_v11, 0.0  ;;  %v758_v26 = vmul.f32 %v744_v52, %v724_v14 }
 0x236   : > { %784 = vst [vmem:[%s1740_s8 + $0x38] sm:$0xff] %v768_v19  ;;  %v771_v27 = vsel %vm738_vm10, %v721_v63, %v755_v18  ;;  %vm741_vm13 = vcmp.gt.f32.partialorder %v724_v14, 0.0  ;;  %v759_v28 = vmul.f32 %v744_v52, %v725_v23  ;;  %v772_v29 = vsel %vm739_vm11, %v722_v8, %v756_v20 }
 0x237   : > { %785 = vst [vmem:[%s1740_s8 + $0x40] sm:$0xff] %v769_v21  ;;  %vm742_vm14 = vcmp.gt.f32.partialorder %v725_v23, 0.0  ;;  %v760_v30 = vmul.f32 %v744_v52, %v726_v24  ;;  %v773_v31 = vsel %vm740_vm12, %v723_v11, %v757_v22  ;;  %vm743_vm15 = vcmp.gt.f32.partialorder %v726_v24, 0.0 }
 0x238   : > { %786 = vst [vmem:[%s1740_s8 + $0x48] sm:$0xff] %v770_v25  ;;  %v774_v32 = vsel %vm741_vm13, %v724_v14, %v758_v26  ;;  %v775_v33 = vsel %vm742_vm14, %v725_v23, %v759_v28 }
 0x239   : > { %787 = vst [vmem:[%s1740_s8 + $0x50] sm:$0xff] %v771_v27  ;;  %v776_v34 = vsel %vm743_vm15, %v726_v24, %v760_v30 }
 0x23a   : > { %788 = vst [vmem:[%s1740_s8 + $0x58] sm:$0xff] %v772_v29 }
 0x23b   : > { %789 = vst [vmem:[%s1740_s8 + $0x60] sm:$0xff] %v773_v31 }
 0x23c   : > { %790 = vst [vmem:[%s1740_s8 + $0x68] sm:$0xff] %v774_v32 }
 0x23d   : > { %791 = vst [vmem:[%s1740_s8 + $0x70] sm:$0xff] %v775_v33 }
 0x23e   : > { %792 = vst [vmem:[%s1740_s8 + $0x78] sm:$0xff] %v776_v34 }
 0x23f PF: > { %s1924_s11 = sld [smem:[#allocation19_spill]]  ;;  %s806_s22 = sshll.u32 %s1740_s8, 4  ;;  %s807_s22 = int_to_ptr.vmem [resolvable:$true] %s806_s22 }
 0x240   : > { %s1926_s0 = sld [smem:[#allocation29_spill]]  ;;  %s794_s29 = scalar_lea.sflag [#allocation6], %s315_s28 }
 0x245   : > { %s1071_s13 = sshll.u32 %s1924_s11, 7 }
 0x246   : > { %s805_s1 = scalar_lea.hbm %s1926_s0, %s1071_s13  ;;  %s1347_s14 = scalar_lea.hbm %s1926_s0, 256 }
 0x247   : > { %s808_s9 = sshll.u32 %s805_s1, 4  ;;  %s809_s9 = int_to_ptr.hbm [resolvable:$true] %s808_s9 }
 0x248   : > { %s1341_s3 = sshra.s32 %s809_s9, 4  ;;  %s1342_s3 = int_to_ptr.hbm [resolvable:$true] %s1341_s3 }
 0x249   : > { %s1343_s20 = scalar_lea.hbm %s1342_s3, 128  ;;  %p1348_p12 = scmp.lt.s32.totalorder %s1342_s3, %s1926_s0 }
 0x24a   : > { %p1344_p11 = scmp.ne.s32.totalorder %s1342_s3, %s1343_s20  ;;  %p1349_p13 = scmp.lt.s32.totalorder %s1347_s14, %s1343_s20 }
 0x24c   : > { %p1345_p0 = pnand %p1344_p11, %p1671_p5  ;;  %p1350_p1 = por %p1349_p13, %p1348_p12 }
 0x24e   : > { %p1346_p3 = pneg %p1345_p0 }
 0x250   : > { %p1351_p4 = pnand %p1350_p1, %p1346_p3 }
 0x252   : > { %1354 = shalt.err (!%p1351_p4)
}
 0x253   : > { %s1488_s28 = smov 128   ;;  %s1489_s8 = smov 8  }
 0x254   : > { %1096 = dma.vmem_to_hbm [thread:$0]  (%p1671_p5), %s807_s22, 2048, %s809_s9, %s794_s29, %s1488_s28, %s1488_s28, %s1489_s8  }
 0x255 PF: > { %s1927_s10 = sld [smem:[#allocation15_spill]]  ;;  %p1116_p6 = scmp.ge.s32.totalorder %s1481_s7, 2 }
 0x257   : > { %p1110_p7 = pnand %p1116_p6, %p1677_p9 }
 0x259   : > { %p1111_p10 = pneg %p1110_p7 }
 0x25b   : > { %s823_s26 = sand.u32 1, %s1927_s10  }
 0x25c   : > { %s824_s11 = scalar_lea.sflag [#allocation6], %s823_s26 }
 0x25d   : > { %1424 = dma.done.wait (%p1111_p10), %s824_s11, 2048  }
 0x25e   : > { %1426 = vsyncadd (%p1111_p10), %s824_s11, 4294965248  ;;  %s23_s7 = sadd.s32 1, %s1481_s7   ;;  %s1930_s16 = sld [smem:[#allocation16_spill]] }
 0x25f   : > { %p1827_p2 = scmp.ge.s32.totalorder %s23_s7, 6   ;;  %s1931_s22 = sld [smem:[#allocation23_spill]] }
 0x260   : > { %s1932_s12 = sld [smem:[#allocation17_spill]]  ;;  %s1936_s20 = smov %s1433_s21 }
 0x261   : > { %s1933_s27 = sld [smem:[#allocation22_spill]]  ;;  %s1938_s23 = smov %s1445_s24 }
 0x262   : > { %s1934_s17 = sld [smem:[#allocation20_spill]]  ;;  %s1939_s24 = smov %s1449_s25 }
 0x263   : > { %s1935_s1 = sld [smem:[#allocation21_spill]]  ;;  %s1940_s25 = smov %s1702_s15 }
 0x264   : > { %s1937_s21 = smov %s1930_s16  ;;  %s1941_s26 = smov %s1457_s4 }
 0x265   : > { %s1943_s28 = smov %s1473_s30  ;;  %s1944_s29 = smov %s1477_s6 }
 0x266   : > { %s1942_s4 = smov %s1932_s12  ;;  %22 = sbr.rel (!%p1827_p2) target bundleno = 17 (0x11), region = 108 }
 0x268   : > { %s1945_s30 = smov %s1934_s17 }
 0x269   : > { %s1946_s6 = smov %s1935_s1 }
 0x26b   :  { %830 = vsyncpa [#allocation5], 1 }
 0x26c   :  { %832 = vsyncpa [#allocation5 + $0x1], 1 }
 0x26d   :  { %833 = vsyncpa [#allocation8], 1 }
 0x26e   :  { %834 = vsyncpa [#allocation6], 1 }
 0x26f   :  { %836 = vsyncpa [#allocation6 + $0x1], 1 }

</bundles_post_ra>
